<compile_context>
chip_gen: v7x
topology: tpu7x:2x2x1
jax: 0.10.0
libtpu: 0.0.40
codegen_flags: <defaults>
</compile_context>

<pallas_src>
import jax
import jax.numpy as jnp
from jax.experimental import pallas as pl
from jax.experimental.pallas import tpu as pltpu

MAX_TB = 512   # upper bound on the batch (lane) tile; always a multiple of 128


def _round_up(n, m):
    return ((n + m - 1) // m) * m


def mlp_kernel(x_ref,        # (4, tb)    f32   input states, feature-major
               w12_ref,      # (128, 4)   f32   folded (W1 @ W2)^T
               b12_ref,      # (128, 1)   f32   folded bias column
               w3_ref,       # (128, 128) bf16  W3^T
               b3_ref,       # (128, 1)   f32
               w4_ref,       # (128, 1)   f32   fc4 weight column
               b4_ref,       # (1, 1)     f32   scalar bias, SMEM
               o_ref):       # (1, tb)    f32   lane-dense output row
    x = x_ref[...]                                        # (4, tb)
    w12 = w12_ref[...]                                    # (128, 4)

    # fc1+fc2 folded (exact in f32): K=4 -> 4 unrolled VPU FMAs, no MXU.
    h2 = b12_ref[...] + w12[:, 0:1] * x[0:1, :]           # (128, tb) f32
    for k in range(1, 4):
        h2 = h2 + w12[:, k:k + 1] * x[k:k + 1, :]
    h2 = jnp.maximum(h2, 0.0).astype(jnp.bfloat16)        # relu + bf16 for MXU

    # fc3 + relu: the single MXU matmul (bf16 operands, f32 accumulation).
    h3 = jnp.dot(w3_ref[...], h2,
                 preferred_element_type=jnp.float32) + b3_ref[...]
    h3 = jnp.maximum(h3, 0.0)                             # (128, tb) f32

    # fc4 (out=1): VPU multiply + feature-axis reduction, scalar bias (SMEM).
    y = jnp.sum(h3 * w4_ref[...], axis=0, keepdims=True) + b4_ref[0, 0]

    o_ref[...] = y.astype(o_ref.dtype)                    # (1, tb)


def model_1_forward(x, kparams, *, max_tb=MAX_TB):
    """x: (B, 4) float32 -> (B, 1) float32."""
    B = x.shape[0]
    lanes = 128
    b128 = _round_up(B, lanes)                 # lane quantum
    n_blocks = -(-b128 // max_tb)              # ceil-div
    tb = _round_up(-(-b128 // n_blocks), lanes)
    b_pad = n_blocks * tb

    # Feature-major, zero-padded input: (4, B_pad), lane-dense blocks.
    x_t = jnp.zeros((4, b_pad), x.dtype).at[:, :B].set(x.T)

    grid_spec = pltpu.PrefetchScalarGridSpec(
        num_scalar_prefetch=0,
        grid=(n_blocks,),
        in_specs=[
            pl.BlockSpec((4, tb), lambda i: (0, i)),             # x (tiled)
            pl.BlockSpec((128, 4), lambda i: (0, 0)),            # w12^T (resident)
            pl.BlockSpec((128, 1), lambda i: (0, 0)),            # b12
            pl.BlockSpec((128, 128), lambda i: (0, 0)),          # w3^T (bf16)
            pl.BlockSpec((128, 1), lambda i: (0, 0)),            # b3
            pl.BlockSpec((128, 1), lambda i: (0, 0)),            # w4 column
            pl.BlockSpec(memory_space=pltpu.MemorySpace.SMEM),   # b4 scalar
        ],
        out_specs=pl.BlockSpec((1, tb), lambda i: (0, i)),
    )

    out = pl.pallas_call(
        mlp_kernel,
        out_shape=jax.ShapeDtypeStruct((1, b_pad), jnp.float32),
        grid_spec=grid_spec,
        compiler_params=pltpu.CompilerParams(
            dimension_semantics=("parallel",)),
    )(x_t,
      kparams["w12t"], kparams["b12c"],
      kparams["w3t"], kparams["b3c"],
      kparams["w4c"], kparams["b4"])

    return out[0, :B].reshape(B, 1)


def init_params(key):
    """PyTorch nn.Linear-style init (U[-1/sqrt(fan_in), +]); layout (in, out)."""
    dims = [(4, 128), (128, 128), (128, 128), (128, 1)]
    params = {}
    for i, (fan_in, fan_out) in enumerate(dims, start=1):
        key, kw, kb = jax.random.split(key, 3)
        bound = 1.0 / (fan_in ** 0.5)
        params[f"w{i}"] = jax.random.uniform(
            kw, (fan_in, fan_out), jnp.float32, -bound, bound)
        params[f"b{i}"] = jax.random.uniform(
            kb, (1, fan_out), jnp.float32, -bound, bound)
    return params


def prepare_kernel_params(p):
    """Fold fc1 into fc2 (no activation between them -> exact) and lay the
    weights out feature-major for the kernel.  Done once, off the hot path."""
    w12 = p["w1"] @ p["w2"]                        # (4, 128) f32
    b12 = p["b1"] @ p["w2"] + p["b2"]              # (1, 128) f32
    return {
        "w12t": w12.T,                             # (128, 4)  f32  (VPU FMAs)
        "b12c": b12.T,                             # (128, 1)  f32
        "w3t": p["w3"].T.astype(jnp.bfloat16),     # (128,128) bf16 (MXU)
        "b3c": p["b3"].T,                          # (128, 1)  f32
        "w4c": p["w4"],                            # (128, 1)  f32  (VPU)
        "b4": p["b4"],                             # (1, 1)    f32 -> SMEM
    }


def reference_forward(x, p):
    """Pure-JAX f32 reference matching the PyTorch forward exactly."""
    h1 = x @ p["w1"] + p["b1"]
    h2 = jnp.maximum(h1 @ p["w2"] + p["b2"], 0.0)
    h3 = jnp.maximum(h2 @ p["w3"] + p["b3"], 0.0)
    return h3 @ p["w4"] + p["b4"]


if __name__ == "__main__":
    key = jax.random.PRNGKey(0)
    key, kx1, kx2 = jax.random.split(key, 3)
    params = init_params(key)
    kparams = prepare_kernel_params(params)

    # Small batch of cartpole states (state dim = 4), as in the RL loop.
    B = 8
    x = jax.random.normal(kx1, (B, 4), dtype=jnp.float32)
    out = jax.block_until_ready(model_1_forward(x, kparams))
    ref = reference_forward(x, params)
    assert out.shape == (B, 1)
    assert jnp.allclose(out, ref, atol=1e-2, rtol=1e-2), \
        float(jnp.max(jnp.abs(out - ref)))

    # Larger, non-multiple-of-128 batch: exercises multi-step grid + padding.
    B2 = 1040
    x2 = jax.random.normal(kx2, (B2, 4), dtype=jnp.float32)
    out2 = jax.block_until_ready(model_1_forward(x2, kparams))
    ref2 = reference_forward(x2, params)
    assert out2.shape == (B2, 1)
    assert jnp.allclose(out2, ref2, atol=1e-2, rtol=1e-2), \
        float(jnp.max(jnp.abs(out2 - ref2)))

    print("KERNEL_OK")
</pallas_src>

<mosaic_0001>
module attributes {stable_mosaic.version = 11 : i64} {
  func.func @mlp_kernel(%arg0: i32, %arg1: memref<4x128xf32, #tpu.memory_space<vmem>>, %arg2: memref<128x4xf32, #tpu.memory_space<vmem>>, %arg3: memref<128x1xf32, #tpu.memory_space<vmem>>, %arg4: memref<128x128xbf16, #tpu.memory_space<vmem>>, %arg5: memref<128x1xf32, #tpu.memory_space<vmem>>, %arg6: memref<128x1xf32, #tpu.memory_space<vmem>>, %arg7: memref<1x1xf32, #tpu.memory_space<smem>>, %arg8: memref<1x128xf32, #tpu.memory_space<vmem>>) attributes {dimension_semantics = [#tpu.dimension_semantics<parallel>], iteration_bounds = array<i64: 1>, scalar_prefetch = 0 : i64, scratch_operands = 0 : i64, tpu.core_type = #tpu.core_type<tc>, window_params = [{transform_indices = @transform_0, window_bounds = array<i64: 4, 128>}, {pipeline_mode = #tpu.pipeline_mode<synchronous>, transform_indices = @transform_1, window_bounds = array<i64: 128, 4>}, {pipeline_mode = #tpu.pipeline_mode<synchronous>, transform_indices = @transform_2, window_bounds = array<i64: 128, 1>}, {pipeline_mode = #tpu.pipeline_mode<synchronous>, transform_indices = @transform_3, window_bounds = array<i64: 128, 128>}, {pipeline_mode = #tpu.pipeline_mode<synchronous>, transform_indices = @transform_4, window_bounds = array<i64: 128, 1>}, {pipeline_mode = #tpu.pipeline_mode<synchronous>, transform_indices = @transform_5, window_bounds = array<i64: 128, 1>}, {transform_indices = @transform_6, window_bounds = array<i64: 1, 1>}, {transform_indices = @transform_7, window_bounds = array<i64: 1, 128>}]} {
    %c0 = arith.constant 0 : index
    %c0_0 = arith.constant 0 : index
    %0 = vector.load %arg1[%c0, %c0_0] : memref<4x128xf32, #tpu.memory_space<vmem>>, vector<4x128xf32>
    %c0_1 = arith.constant 0 : index
    %c0_2 = arith.constant 0 : index
    %1 = vector.load %arg2[%c0_1, %c0_2] : memref<128x4xf32, #tpu.memory_space<vmem>>, vector<128x4xf32>
    %c0_3 = arith.constant 0 : index
    %c0_4 = arith.constant 0 : index
    %2 = vector.load %arg3[%c0_3, %c0_4] : memref<128x1xf32, #tpu.memory_space<vmem>>, vector<128x1xf32>
    %3 = vector.extract_strided_slice %1 {offsets = [0, 0], sizes = [128, 1], strides = [1, 1]} : vector<128x4xf32> to vector<128x1xf32>
    %4 = vector.extract_strided_slice %0 {offsets = [0, 0], sizes = [1, 128], strides = [1, 1]} : vector<4x128xf32> to vector<1x128xf32>
    %5 = vector.broadcast %3 : vector<128x1xf32> to vector<128x128xf32>
    %6 = vector.broadcast %4 : vector<1x128xf32> to vector<128x128xf32>
    %7 = arith.mulf %5, %6 : vector<128x128xf32>
    %8 = vector.broadcast %2 : vector<128x1xf32> to vector<128x128xf32>
    %9 = arith.addf %8, %7 : vector<128x128xf32>
    %10 = vector.extract_strided_slice %1 {offsets = [0, 1], sizes = [128, 1], strides = [1, 1]} : vector<128x4xf32> to vector<128x1xf32>
    %11 = vector.extract_strided_slice %0 {offsets = [1, 0], sizes = [1, 128], strides = [1, 1]} : vector<4x128xf32> to vector<1x128xf32>
    %12 = vector.broadcast %10 : vector<128x1xf32> to vector<128x128xf32>
    %13 = vector.broadcast %11 : vector<1x128xf32> to vector<128x128xf32>
    %14 = arith.mulf %12, %13 : vector<128x128xf32>
    %15 = arith.addf %9, %14 : vector<128x128xf32>
    %16 = vector.extract_strided_slice %1 {offsets = [0, 2], sizes = [128, 1], strides = [1, 1]} : vector<128x4xf32> to vector<128x1xf32>
    %17 = vector.extract_strided_slice %0 {offsets = [2, 0], sizes = [1, 128], strides = [1, 1]} : vector<4x128xf32> to vector<1x128xf32>
    %18 = vector.broadcast %16 : vector<128x1xf32> to vector<128x128xf32>
    %19 = vector.broadcast %17 : vector<1x128xf32> to vector<128x128xf32>
    %20 = arith.mulf %18, %19 : vector<128x128xf32>
    %21 = arith.addf %15, %20 : vector<128x128xf32>
    %22 = vector.extract_strided_slice %1 {offsets = [0, 3], sizes = [128, 1], strides = [1, 1]} : vector<128x4xf32> to vector<128x1xf32>
    %23 = vector.extract_strided_slice %0 {offsets = [3, 0], sizes = [1, 128], strides = [1, 1]} : vector<4x128xf32> to vector<1x128xf32>
    %24 = vector.broadcast %22 : vector<128x1xf32> to vector<128x128xf32>
    %25 = vector.broadcast %23 : vector<1x128xf32> to vector<128x128xf32>
    %26 = arith.mulf %24, %25 : vector<128x128xf32>
    %27 = arith.addf %21, %26 : vector<128x128xf32>
    %cst = arith.constant 0.000000e+00 : f32
    %28 = vector.broadcast %cst : f32 to vector<128x128xf32>
    %29 = arith.maximumf %27, %28 : vector<128x128xf32>
    %30 = arith.truncf %29 : vector<128x128xf32> to vector<128x128xbf16>
    %c0_5 = arith.constant 0 : index
    %c0_6 = arith.constant 0 : index
    %31 = vector.load %arg4[%c0_5, %c0_6] : memref<128x128xbf16, #tpu.memory_space<vmem>>, vector<128x128xbf16>
    %cst_7 = arith.constant dense<0.000000e+00> : vector<128x128xf32>
    %32 = tpu.matmul %31, %30, %cst_7 {dimension_numbers = #tpu.dot_dimension_numbers<[1], [0], [0], [1], [0, 0, 1, 1], [], []>} : vector<128x128xbf16>, vector<128x128xbf16>, vector<128x128xf32> -> vector<128x128xf32>
    %c0_8 = arith.constant 0 : index
    %c0_9 = arith.constant 0 : index
    %33 = vector.load %arg5[%c0_8, %c0_9] : memref<128x1xf32, #tpu.memory_space<vmem>>, vector<128x1xf32>
    %34 = vector.broadcast %33 : vector<128x1xf32> to vector<128x128xf32>
    %35 = arith.addf %32, %34 : vector<128x128xf32>
    %cst_10 = arith.constant 0.000000e+00 : f32
    %36 = vector.broadcast %cst_10 : f32 to vector<128x128xf32>
    %37 = arith.maximumf %35, %36 : vector<128x128xf32>
    %c0_11 = arith.constant 0 : index
    %c0_12 = arith.constant 0 : index
    %38 = vector.load %arg6[%c0_11, %c0_12] : memref<128x1xf32, #tpu.memory_space<vmem>>, vector<128x1xf32>
    %39 = vector.broadcast %38 : vector<128x1xf32> to vector<128x128xf32>
    %40 = arith.mulf %37, %39 : vector<128x128xf32>
    %cst_13 = arith.constant dense<0.000000e+00> : vector<128xf32>
    %41 = vector.multi_reduction <add>, %40, %cst_13 [0] : vector<128x128xf32> to vector<128xf32>
    %42 = vector.shape_cast %41 : vector<128xf32> to vector<1x128xf32>
    %c0_14 = arith.constant 0 : index
    %c0_15 = arith.constant 0 : index
    %43 = memref.load %arg7[%c0_14, %c0_15] : memref<1x1xf32, #tpu.memory_space<smem>>
    %44 = vector.broadcast %43 : f32 to vector<1x128xf32>
    %45 = arith.addf %42, %44 : vector<1x128xf32>
    %c0_16 = arith.constant 0 : index
    %c0_17 = arith.constant 0 : index
    %46 = vector.load %arg8[%c0_16, %c0_17] : memref<1x128xf32, #tpu.memory_space<vmem>>, vector<1x128xf32>
    tpu.vector_store %arg8[%c0_16, %c0_17], %45 {strides = array<i32>} : memref<1x128xf32, #tpu.memory_space<vmem>>, vector<1x128xf32>,
    return
  }
  func.func @transform_0(%arg0: i32) -> (i32, i32) {
    %c0_i32 = arith.constant 0 : i32
    %c0_i32_0 = arith.constant 0 : i32
    return %c0_i32, %arg0 : i32, i32
  }
  func.func @transform_1(%arg0: i32) -> (i32, i32) {
    %c0_i32 = arith.constant 0 : i32
    %c0_i32_0 = arith.constant 0 : i32
    %c0_i32_1 = arith.constant 0 : i32
    return %c0_i32, %c0_i32_0 : i32, i32
  }
  func.func @transform_2(%arg0: i32) -> (i32, i32) {
    %c0_i32 = arith.constant 0 : i32
    %c0_i32_0 = arith.constant 0 : i32
    %c0_i32_1 = arith.constant 0 : i32
    return %c0_i32, %c0_i32_0 : i32, i32
  }
  func.func @transform_3(%arg0: i32) -> (i32, i32) {
    %c0_i32 = arith.constant 0 : i32
    %c0_i32_0 = arith.constant 0 : i32
    %c0_i32_1 = arith.constant 0 : i32
    return %c0_i32, %c0_i32_0 : i32, i32
  }
  func.func @transform_4(%arg0: i32) -> (i32, i32) {
    %c0_i32 = arith.constant 0 : i32
    %c0_i32_0 = arith.constant 0 : i32
    %c0_i32_1 = arith.constant 0 : i32
    return %c0_i32, %c0_i32_0 : i32, i32
  }
  func.func @transform_5(%arg0: i32) -> (i32, i32) {
    %c0_i32 = arith.constant 0 : i32
    %c0_i32_0 = arith.constant 0 : i32
    %c0_i32_1 = arith.constant 0 : i32
    return %c0_i32, %c0_i32_0 : i32, i32
  }
  func.func @transform_6(%arg0: i32) -> (i32, i32) {
    %c0_i32 = arith.constant 0 : i32
    %c0_i32_0 = arith.constant 0 : i32
    %c0_i32_1 = arith.constant 0 : i32
    return %c0_i32, %c0_i32_0 : i32, i32
  }
  func.func @transform_7(%arg0: i32) -> (i32, i32) {
    %c0_i32 = arith.constant 0 : i32
    %c0_i32_0 = arith.constant 0 : i32
    return %c0_i32, %arg0 : i32, i32
  }
}

</mosaic_0001>

<bundles_post_ra>
// kernel: tpu_custom_call.1
= control target key start
LH: loop header
LB: loop body
LE: loop exit
PB: predicated region body
PF: predicated region fallthrough
CT: control target
= control target key end

     0   :  { %v1153_v2 = vmov 2   ;;  %v1154_v3 = vmov 0   ;;  %v1155_v9 = vmov 1   ;;  %s1734_s0 = inlined_call_operand.vmem [shape: f32[4,128], index: 0, kind: input, shape index: {}]   ;;  %s1735_s1 = inlined_call_operand.vmem [shape: f32[128,4], index: 1, kind: input, shape index: {}]   ;;  %s1736_s2 = inlined_call_operand.vmem [shape: f32[128,1], index: 2, kind: input, shape index: {}]   ;;  %s1737_s3 = inlined_call_operand.vmem [shape: bf16[128,128], index: 3, kind: input, shape index: {}]   ;;  %s1738_s4 = inlined_call_operand.vmem [shape: f32[128,1], index: 4, kind: input, shape index: {}]   ;;  %s1739_s5 = inlined_call_operand.vmem [shape: f32[128,1], index: 5, kind: input, shape index: {}]   ;;  %s1740_s6 = inlined_call_operand.<no memory space> [shape: f32[1,1], index: 6, kind: input, shape index: {}]   ;;  %s1741_s7 = inlined_call_operand.hbm [shape: f32[1,128], index: 7, kind: output, shape index: {}]  }
   0x1   :  { %v1201_v0 = vld [vmem:[%s1735_s1 + $0x18] sm:$0xff]  ;;  %v1206_v1 = vld [vmem:[%s1735_s1 + $0x10] sm:$0xff]  ;;  %1089 = vset.pattern.permute.xlu0 %v1153_v2  ;;  %1083 = vset.pattern.permute.xlu1 %v1154_v3  ;;  %v1222_v5 = vld [vmem:[%s1735_s1 + $0x48] sm:$0xff] }
   0x2   :  { %371 = vperm.xlu0 %1089, %v1201_v0   ;;  %74 = vperm.xlu1 %1083, %v1206_v1   ;;  %v1215_v4 = vld [vmem:[%s1735_s1 + $0x30] sm:$0xff]  ;;  %v1227_v6 = vld [vmem:[%s1735_s1 + $0x28] sm:$0xff]  ;;  %v1232_v7 = vld [vmem:[%s1735_s1 + $0x38] sm:$0xff] }
   0x3   :  { %v31_v8 = vld [vmem:[%s1735_s1 + $0x8] sm:$0xff] }
   0x6   :  { %383 = vperm.xlu0 %1089, %v1215_v4   ;;  %79 = vperm.xlu1 %1083, %v1201_v0  }
   0xa   :  { %395 = vperm.xlu0 %1089, %v1222_v5   ;;  %89 = vperm.xlu1 %1083, %v1227_v6  }
   0xe   :  { %1102 = vset.pattern.permute.xlu0 %v1155_v9  ;;  %99 = vperm.xlu1 %1083, %v1232_v7  }
   0xf   :  { %263 = vperm.xlu0 %1102, %v31_v8  }
  0x10   :  { %13 = vsyncpa [#allocation4], 0  ;;  %v1244_v10 = vld [vmem:[%s1735_s1 + $0x20] sm:$0xff]  ;;  %v1251_v11 = vld [vmem:[%s1735_s1 + $0x58] sm:$0xff]  ;;  %v1156_v19 = vmov 3   ;;  %v142_v52 = vlaneseq  ;;  %s1157_s18 = smov [#allocation3]  }
  0x11   :  { %v1258_v12 = vld [vmem:[%s1735_s1 + $0x68] sm:$0xff]  ;;  %v1263_v13 = vld [vmem:[%s1735_s1 + $0x50] sm:$0xff]  ;;  %v1270_v14 = vld [vmem:[%s1735_s1 + $0x78] sm:$0xff]  ;;  %s998_s19 = sshll.u32 %s1157_s18, 4  ;;  %s999_s19 = int_to_ptr.vmem [resolvable:$true] %s998_s19 }
  0x12   :  { %109 = vperm.xlu1 %1083, %v1222_v5   ;;  %v47_v15 = vld [vmem:[%s1736_s2 + $0x8] sm:$0xff]  ;;  %v30_v16 = vld [vmem:[%s1735_s1] sm:$0xff]  ;;  %v1305_v20 = vld [vmem:[%s1735_s1 + $0x70] sm:$0xff]  ;;  %v143_v55 = vshrl.u32 %v142_v52, 7  ;;  %s1129_s20 = scalar_lea.vmem %s999_s19, 16  ;;  %s1133_s21 = scalar_lea.vmem %s999_s19, 32 }
  0x13   :  { %275 = vperm.xlu0 %1102, %v1244_v10   ;;  %v1288_v17 = vld [vmem:[%s1735_s1 + $0x40] sm:$0xff]  ;;  %v48_v22 = vld [vmem:[%s1736_s2 + $0x10] sm:$0xff]  ;;  %v49_v24 = vld [vmem:[%s1736_s2 + $0x18] sm:$0xff]  ;;  %p1130_p0 = scmp.ne.s32.totalorder %s999_s19, %s1129_s20  ;;  %p1134_p1 = scmp.lt.s32.totalorder %s999_s19, %s999_s19 }
  0x14   :  { %v1298_v18 = vld [vmem:[%s1735_s1 + $0x60] sm:$0xff]  ;;  %v51_v25 = vld [vmem:[%s1736_s2 + $0x28] sm:$0xff]  ;;  %v52_v26 = vld [vmem:[%s1736_s2 + $0x30] sm:$0xff]  ;;  %v144_v59 = vsub.s32 0, %v143_v55  ;;  %p1135_p2 = scmp.lt.s32.totalorder %s1133_s21, %s1129_s20 }
  0x15   :  { %v46_v21 = vld [vmem:[%s1736_s2] sm:$0xff]  ;;  %v55_v27 = vld [vmem:[%s1736_s2 + $0x48] sm:$0xff]  ;;  %v61_v29 = vld [vmem:[%s1736_s2 + $0x78] sm:$0xff] }
  0x16   :  { %119 = vperm.xlu1 %1083, %v1251_v11   ;;  %v50_v23 = vld [vmem:[%s1736_s2 + $0x20] sm:$0xff]  ;;  %v53_v30 = vld [vmem:[%s1736_s2 + $0x38] sm:$0xff]  ;;  %v56_v41 = vld [vmem:[%s1736_s2 + $0x50] sm:$0xff]  ;;  %p1136_p3 = por %p1135_p2, %p1134_p1 }
  0x17   :  { %287 = vperm.xlu0 %1102, %v1232_v7   ;;  %v58_v28 = vld [vmem:[%s1736_s2 + $0x60] sm:$0xff]  ;;  %v57_v44 = vld [vmem:[%s1736_s2 + $0x58] sm:$0xff]  ;;  %v59_v58 = vld [vmem:[%s1736_s2 + $0x68] sm:$0xff] }
  0x18   :  { %v54_v31 = vld [vmem:[%s1736_s2 + $0x40] sm:$0xff]  ;;  %p1137_p4 = pnand %p1136_p3, %p1130_p0 }
  0x19   :  { %v29_v60 = vld [vmem:[%s1734_s0] sm:$0xf] }
  0x1a   :  { %129 = vperm.xlu1 %1083, %v1258_v12   ;;  %v1439_v63 = vrot.slane %v29_v60, %v144_v59 }
  0x1b   :  { %299 = vperm.xlu0 %1102, %v1263_v13  }
  0x1e   :  { %139 = vperm.xlu1 %1083, %v1270_v14  }
  0x1f   :  { %311 = vperm.xlu0 %1102, %v1258_v12  }
  0x22   :  { %169 = vperm.xlu1 %1083, %v47_v15  }
  0x23   :  { %1109 = vset.pattern.permute.xlu0 %v1154_v3 }
  0x24   :  { %64 = vperm.xlu0 %1109, %v30_v16  }
  0x26   :  { %1084 = vset.pattern.permute.xlu1 %v1155_v9 }
  0x27   :  { %259 = vperm.xlu1 %1084, %v30_v16  }
  0x28   :  { %69 = vperm.xlu0 %1109, %v31_v8  }
  0x2b   :  { %1085 = vset.pattern.permute.xlu1 %v1153_v2 }
  0x2c   :  { %84 = vperm.xlu0 %1109, %v1244_v10   ;;  %359 = vperm.xlu1 %1085, %v30_v16  }
  0x30   :  { %94 = vperm.xlu0 %1109, %v1215_v4   ;;  %363 = vperm.xlu1 %1085, %v31_v8  }
  0x34   :  { %104 = vperm.xlu0 %1109, %v1288_v17   ;;  %1086 = vset.pattern.permute.xlu1 %v1155_v9 }
  0x35   :  { %267 = vperm.xlu1 %1086, %v1206_v1  }
  0x38   :  { %114 = vperm.xlu0 %1109, %v1263_v13  }
  0x39   :  { %271 = vperm.xlu1 %1086, %v1201_v0  }
  0x3c   :  { %124 = vperm.xlu0 %1109, %v1298_v18  }
  0x3d   :  { %1087 = vset.pattern.permute.xlu1 %v1156_v19 }
  0x3e   :  { %463 = vperm.xlu1 %1087, %v31_v8  }
  0x40   :  { %134 = vperm.xlu0 %1109, %v1305_v20  }
  0x42   :  { %1088 = vset.pattern.permute.xlu1 %v1153_v2 }
  0x43   :  { %367 = vperm.xlu1 %1088, %v1206_v1  }
  0x44   :  { %164 = vperm.xlu0 %1109, %v46_v21  }
  0x47   :  { %1090 = vset.pattern.permute.xlu1 %v1154_v3 }
  0x48   :  { %174 = vperm.xlu0 %1109, %v48_v22   ;;  %184 = vperm.xlu1 %1090, %v50_v23  }
  0x4c   :  { %179 = vperm.xlu0 %1109, %v49_v24   ;;  %189 = vperm.xlu1 %1090, %v51_v25  }
  0x50   :  { %194 = vperm.xlu0 %1109, %v52_v26   ;;  %1091 = vset.pattern.permute.xlu1 %v1155_v9 }
  0x51   :  { %279 = vperm.xlu1 %1091, %v1227_v6  }
  0x54   :  { %209 = vperm.xlu0 %1109, %v55_v27   ;;  %v324_v27 = vsub.s32 1, %v143_v55 }
  0x55   :  { %1092 = vset.pattern.permute.xlu1 %v1156_v19 }
  0x56   :  { %467 = vperm.xlu1 %1092, %v1206_v1  }
  0x58   :  { %224 = vperm.xlu0 %1109, %v58_v28  }
  0x5a   :  { %1093 = vset.pattern.permute.xlu1 %v1153_v2 }
  0x5b   :  { %375 = vperm.xlu1 %1093, %v1244_v10  }
  0x5c   :  { %239 = vperm.xlu0 %1109, %v61_v29   ;;  %v424_v29 = vsub.s32 2, %v143_v55 }
  0x5e   :  { %v1485_v59 = vrot.slane %v29_v60, %v424_v29 }
  0x5f   :  { %379 = vperm.xlu1 %1093, %v1227_v6  }
  0x60   :  { %1113 = vset.pattern.permute.xlu0 %v1156_v19 }
  0x61   :  { %459 = vperm.xlu0 %1113, %v30_v16  }
  0x63   :  { %1094 = vset.pattern.permute.xlu1 %v1154_v3 }
  0x64   :  { %199 = vperm.xlu1 %1094, %v53_v30  }
  0x65   :  { %471 = vperm.xlu0 %1113, %v1201_v0  }
  0x68   :  { %1095 = vset.pattern.permute.xlu1 %v1155_v9 }
  0x69   :  { %283 = vperm.xlu1 %1095, %v1215_v4   ;;  %483 = vperm.xlu0 %1113, %v1215_v4  }
  0x6d   :  { %1096 = vset.pattern.permute.xlu1 %v1156_v19  ;;  %495 = vperm.xlu0 %1113, %v1222_v5  }
  0x6e   :  { %475 = vperm.xlu1 %1096, %v1244_v10  }
  0x71   :  { %507 = vperm.xlu0 %1113, %v1298_v18  }
  0x72   :  { %479 = vperm.xlu1 %1096, %v1227_v6  }
  0x75   :  { %1115 = vset.pattern.permute.xlu0 %v1153_v2 }
  0x76   :  { %1097 = vset.pattern.permute.xlu1 %v1153_v2  ;;  %407 = vperm.xlu0 %1115, %v1298_v18  }
  0x77   :  { %387 = vperm.xlu1 %1097, %v1232_v7  }
  0x7a   :  { %419 = vperm.xlu0 %1115, %v1270_v14  }
  0x7b   :  { %1098 = vset.pattern.permute.xlu1 %v1154_v3 }
  0x7c   :  { %204 = vperm.xlu1 %1098, %v54_v31  }
  0x7e   :  { %1119 = vset.pattern.permute.xlu0 %v1154_v3 }
  0x80   :  { %1099 = vset.pattern.permute.xlu1 %v1155_v9 }
  0x81   :  { %v1370_v32 = vpop.permute.xlu1 %74  ;;  %291 = vperm.xlu1 %1099, %v1288_v17   ;;  %v1373_v33 = vpop.permute.xlu0 %371 }
  0x85   :  { %v1375_v34 = vpop.permute.xlu1 %79  ;;  %295 = vperm.xlu1 %1099, %v1222_v5   ;;  %v1378_v35 = vpop.permute.xlu0 %383 }
  0x89   :  { %v1380_v36 = vpop.permute.xlu1 %89  ;;  %1100 = vset.pattern.permute.xlu1 %v1156_v19  ;;  %v1383_v37 = vpop.permute.xlu0 %395 }
  0x8a   :  { %487 = vperm.xlu1 %1100, %v1232_v7  }
  0x8d   :  { %v1386_v38 = vpop.permute.xlu1 %99 }
  0x8e   :  { %1101 = vset.pattern.permute.xlu1 %v1153_v2  ;;  %v1389_v39 = vpop.permute.xlu0 %263 }
  0x8f   :  { %391 = vperm.xlu1 %1101, %v1288_v17  }
  0x91   :  { %v1392_v40 = vpop.permute.xlu1 %109 }
  0x92   :  { %v1397_v42 = vpop.permute.xlu0 %275  ;;  %v155_v28 = vmul.f32 %v1439_v63, %v1392_v40 }
  0x93   :  { %1103 = vset.pattern.permute.xlu1 %v1154_v3 }
  0x94   :  { %214 = vperm.xlu1 %1103, %v56_v41   ;;  %v524_v41 = vsub.s32 3, %v143_v55 }
  0x95   :  { %v1400_v43 = vpop.permute.xlu1 %119 }
  0x96   :  { %v1405_v45 = vpop.permute.xlu0 %287  ;;  %v1490_v55 = vrot.slane %v29_v60, %v524_v41 }
  0x98   :  { %219 = vperm.xlu1 %1103, %v57_v44  }
  0x99   :  { %v1407_v46 = vpop.permute.xlu1 %129 }
  0x9a   :  { %v1409_v47 = vpop.permute.xlu0 %299 }
  0x9c   :  { %1104 = vset.pattern.permute.xlu1 %v1155_v9 }
  0x9d   :  { %v1412_v48 = vpop.permute.xlu1 %139  ;;  %303 = vperm.xlu1 %1104, %v1251_v11  }
  0x9e   :  { %v1415_v49 = vpop.permute.xlu0 %311 }
  0xa1   :  { %v1417_v50 = vpop.permute.xlu1 %169  ;;  %1105 = vset.pattern.permute.xlu1 %v1156_v19 }
  0xa2   :  { %491 = vperm.xlu1 %1105, %v1288_v17  }
  0xa3   :  { %v65_v51 = vpop.permute.xlu0 %64 }
  0xa6   :  { %1106 = vset.pattern.permute.xlu1 %v1153_v2  ;;  %v1422_v53 = vpop.permute.xlu1 %259 }
  0xa7   :  { %v70_v54 = vpop.permute.xlu0 %69  ;;  %399 = vperm.xlu1 %1106, %v1263_v13  }
  0xa8   :  { %v147_v31 = vmul.f32 %v1439_v63, %v70_v54 }
  0xaa   :  { %v243_v54 = vadd.f32 %v1417_v50, %v147_v31 }
  0xab   :  { %v1425_v56 = vpop.permute.xlu0 %84  ;;  %403 = vperm.xlu1 %1106, %v1251_v11   ;;  %v1428_v57 = vpop.permute.xlu1 %359 }
  0xaf   :  { %v1436_v61 = vpop.permute.xlu0 %94  ;;  %1107 = vset.pattern.permute.xlu1 %v1154_v3  ;;  %v364_v62 = vpop.permute.xlu1 %363 }
  0xb0   :  { %229 = vperm.xlu1 %1107, %v59_v58   ;;  %v1482_v58 = vrot.slane %v29_v60, %v324_v27 }
  0xb2   :  { %v327_v40 = vmul.f32 %v1482_v58, %v1389_v39  ;;  %v149_v39 = vmul.f32 %v1439_v63, %v1375_v34  ;;  %v326_v50 = vmul.f32 %v1482_v58, %v1422_v53  ;;  %v426_v34 = vmul.f32 %v1485_v59, %v1428_v57 }
  0xb3   :  { %v105_v0 = vpop.permute.xlu0 %104 }
  0xb4   :  { %v1442_v1 = vmul.f32 %v1439_v63, %v105_v0  ;;  %1108 = vset.pattern.permute.xlu1 %v1155_v9  ;;  %v268_v4 = vpop.permute.xlu1 %267 }
  0xb5   :  { %307 = vperm.xlu1 %1108, %v1298_v18  }
  0xb7   :  { %v115_v5 = vpop.permute.xlu0 %114 }
  0xb8   :  { %v1447_v6 = vmul.f32 %v1439_v63, %v115_v5  ;;  %v1449_v7 = vpop.permute.xlu1 %271 }
  0xb9   :  { %1110 = vset.pattern.permute.xlu1 %v1156_v19  ;;  %v329_v53 = vmul.f32 %v1482_v58, %v1449_v7  ;;  %v152_v7 = vmul.f32 %v1439_v63, %v1436_v61 }
  0xba   :  { %499 = vperm.xlu1 %1110, %v1263_v13   ;;  %v60_v13 = vld [vmem:[%s1736_s2 + $0x70] sm:$0xff] }
  0xbb   :  { %v125_v8 = vpop.permute.xlu0 %124 }
  0xbc   :  { %v158_v10 = vmul.f32 %v1439_v63, %v125_v8 }
  0xbd   :  { %v464_v15 = vpop.permute.xlu1 %463 }
  0xbe   :  { %503 = vperm.xlu1 %1110, %v1251_v11  }
  0xbf   :  { %v135_v16 = vpop.permute.xlu0 %134 }
  0xc0   :  { %v1456_v17 = vmul.f32 %v1439_v63, %v135_v16  ;;  %v161_v16 = vmul.f32 %v1439_v63, %v1412_v48  ;;  %v328_v48 = vmul.f32 %v1482_v58, %v268_v4 }
  0xc2   :  { %1111 = vset.pattern.permute.xlu1 %v1153_v2  ;;  %v368_v18 = vpop.permute.xlu1 %367 }
  0xc3   :  { %v165_v21 = vpop.permute.xlu0 %164  ;;  %411 = vperm.xlu1 %1111, %v1258_v12   ;;  %v428_v31 = vmul.f32 %v1485_v59, %v368_v18 }
  0xc7   :  { %v175_v22 = vpop.permute.xlu0 %174  ;;  %1112 = vset.pattern.permute.xlu1 %v1154_v3  ;;  %v1464_v23 = vpop.permute.xlu1 %184 }
  0xc8   :  { %234 = vperm.xlu1 %1112, %v60_v13  }
  0xcb   :  { %v180_v11 = vpop.permute.xlu0 %179  ;;  %v1466_v24 = vpop.permute.xlu1 %189 }
  0xcc   :  { %1114 = vset.pattern.permute.xlu1 %v1155_v9  ;;  %v146_v9 = vmul.f32 %v1439_v63, %v65_v51  ;;  %v148_v51 = vmul.f32 %v1439_v63, %v1370_v32  ;;  %v343_v32 = vadd.f32 %v327_v40, %v243_v54 }
  0xcd   :  { %315 = vperm.xlu1 %1114, %v1305_v20  }
  0xce   :  { %v242_v8 = vadd.f32 %v165_v21, %v146_v9  ;;  %v244_v60 = vadd.f32 %v175_v22, %v148_v51  ;;  %v527_v21 = vmul.f32 %v1490_v55, %v464_v15  ;;  %v429_v15 = vmul.f32 %v1485_v59, %v1373_v33 }
  0xcf   :  { %v1470_v25 = vpop.permute.xlu0 %194  ;;  %v150_v33 = vmul.f32 %v1439_v63, %v1425_v56 }
  0xd0   :  { %v1472_v26 = vpop.permute.xlu1 %279  ;;  %v344_v22 = vadd.f32 %v328_v48, %v244_v60  ;;  %v599_v48 = vld [vmem:[%s1738_s4 + $0x8] sm:$0xff] }
  0xd1   :  { %319 = vperm.xlu1 %1114, %v1270_v14   ;;  %v246_v56 = vadd.f32 %v1464_v23, %v150_v33 }
  0xd3   :  { %v210_v30 = vpop.permute.xlu0 %209 }
  0xd4   :  { %v1478_v44 = vadd.f32 %v210_v30, %v155_v28 }
  0xd5   :  { %1116 = vset.pattern.permute.xlu1 %v1156_v19  ;;  %v468_v52 = vpop.permute.xlu1 %467 }
  0xd6   :  { %511 = vperm.xlu1 %1116, %v1258_v12   ;;  %v427_v12 = vmul.f32 %v1485_v59, %v364_v62  ;;  %v342_v62 = vadd.f32 %v326_v50, %v242_v8  ;;  %v528_v41 = vmul.f32 %v1490_v55, %v468_v52 }
  0xd7   :  { %v225_v0 = vpop.permute.xlu0 %224 }
  0xd8   :  { %v1492_v5 = vadd.f32 %v225_v0, %v158_v10  ;;  %v443_v28 = vadd.f32 %v427_v12, %v343_v32  ;;  %v442_v9 = vadd.f32 %v426_v34, %v342_v62  ;;  %v444_v0 = vadd.f32 %v428_v31, %v344_v22 }
  0xda   :  { %1117 = vset.pattern.permute.xlu1 %v1153_v2  ;;  %v376_v13 = vpop.permute.xlu1 %375  ;;  %v245_v2 = vadd.f32 %v180_v11, %v149_v39  ;;  %v543_v30 = vadd.f32 %v527_v21, %v443_v28  ;;  %v330_v39 = vmul.f32 %v1482_v58, %v1397_v42  ;;  %v151_v42 = vmul.f32 %v1439_v63, %v1380_v36  ;;  %v1122_v36 = vld [vmem:[%s1737_s3 + $0x20] sm:$0xff]  }
  0xdb   :  { %v240_v10 = vpop.permute.xlu0 %239  ;;  %415 = vperm.xlu1 %1117, %v1305_v20   ;;  %v430_v23 = vmul.f32 %v1485_v59, %v376_v13  ;;  %1054 = vmatprep.mubr.bf16.mxu1 %v1122_v36  ;;  %v862_v36 = vld [vmem:[%s1739_s5 + $0x38] sm:$0xff] }
  0xdc   :  { %v1506_v27 = vadd.f32 %v240_v10, %v161_v16  ;;  %v345_v11 = vadd.f32 %v329_v53, %v245_v2  ;;  %v559_v18 = vmax.f32 %v543_v30, 0.0  ;;  %v248_v16 = vadd.f32 %v1470_v25, %v152_v7  ;;  %v600_v30 = vld [vmem:[%s1738_s4 + $0x10] sm:$0xff] }
  0xdd   :  { %v432_v25 = vmul.f32 %v1485_v59, %v1378_v35  ;;  %v346_v62 = vadd.f32 %v330_v39, %v246_v56  ;;  %v1121_v35 = vld [vmem:[%s1737_s3] sm:$0xff]   ;;  %v247_v13 = vadd.f32 %v1466_v24, %v151_v42  ;;  %v601_v24 = vld [vmem:[%s1738_s4 + $0x18] sm:$0xff] }
  0xde   :  { %v380_v29 = vpop.permute.xlu1 %379  ;;  %v445_v52 = vadd.f32 %v429_v15, %v345_v11  ;;  %1046 = vmatprep.mubr.bf16.mxu0 %v1121_v35 }
  0xdf   :  { %1118 = vset.pattern.permute.xlu1 %v1156_v19  ;;  %v431_v34 = vmul.f32 %v1485_v59, %v380_v29  ;;  %v446_v15 = vadd.f32 %v430_v23, %v346_v62  ;;  %v606_v23 = vld [vmem:[%s1738_s4 + $0x40] sm:$0xff] }
  0xe0   :  { %v460_v4 = vpop.permute.xlu0 %459  ;;  %515 = vperm.xlu1 %1118, %v1305_v20   ;;  %v544_v20 = vadd.f32 %v528_v41, %v444_v0 }
  0xe1   :  { %v526_v57 = vmul.f32 %v1490_v55, %v460_v4 }
  0xe2   :  { %v560_v60 = vmax.f32 %v544_v20, 0.0 }
  0xe3   :  { %v542_v19 = vadd.f32 %v526_v57, %v442_v9  ;;  %v1522_v40 = vpop.permute.xlu1 %199  ;;  %v855_v9 = vld [vmem:[%s1739_s5] sm:$0xff]  ;;  %v856_v57 = vld [vmem:[%s1739_s5 + $0x8] sm:$0xff] }
  0xe4   :  { %v472_v54 = vpop.permute.xlu0 %471  ;;  %519 = vperm.xlu1 %1118, %v1270_v14  }
  0xe5   :  { %v558_v51 = vmax.f32 %v542_v19, 0.0  ;;  %v529_v8 = vmul.f32 %v1490_v55, %v472_v54  ;;  %v857_v54 = vld [vmem:[%s1739_s5 + $0x10] sm:$0xff] }
  0xe7   :  { %v574_v12 = vpack.c.bf16 %v559_v18, %v558_v51  ;;  %v545_v61 = vadd.f32 %v529_v8, %v445_v52  ;;  %v602_v18 = vld [vmem:[%s1738_s4 + $0x20] sm:$0xff]  ;;  %v603_v51 = vld [vmem:[%s1738_s4 + $0x28] sm:$0xff]  ;;  %v858_v52 = vld [vmem:[%s1739_s5 + $0x18] sm:$0xff] }
  0xe8   :  { %v284_v50 = vpop.permute.xlu1 %283  ;;  %1120 = vset.pattern.permute.xlu1 %v1154_v3  ;;  %v331_v3 = vmul.f32 %v1482_v58, %v1472_v26  ;;  %v598_v26 = vld [vmem:[%s1738_s4] sm:$0xff]  ;;  %v484_v39 = vpop.permute.xlu0 %483 }
  0xe9   :  { %v561_v10 = vmax.f32 %v545_v61, 0.0  ;;  %v332_v14 = vmul.f32 %v1482_v58, %v284_v50  ;;  %1030 = vmatprep.subr.bf16.mxu0 %v574_v12  ;;  %1062 = vmatprep.subr.bf16.mxu1 %v574_v12  ;;  %v153_v61 = vmul.f32 %v1439_v63, %v1386_v38  ;;  %v333_v50 = vmul.f32 %v1482_v58, %v1405_v45 }
  0xea   :  { %1031 = vmatpush3.bf16.msra.mxu0 %v574_v12  ;;  %1070 = vmatpush3.bf16.msra.mxu1 %v574_v12  ;;  %v347_v22 = vadd.f32 %v331_v3, %v247_v13  ;;  %v859_v12 = vld [vmem:[%s1739_s5 + $0x20] sm:$0xff]  ;;  %v532_v38 = vmul.f32 %v1490_v55, %v484_v39  ;;  %v435_v45 = vmul.f32 %v1485_v59, %v1383_v37  ;;  %v868_v39 = vld [vmem:[%s1739_s5 + $0x68] sm:$0xff] }
  0xeb   :  { %v575_v32 = vpack.c.bf16 %v561_v10, %v560_v60  ;;  %v348_v21 = vadd.f32 %v332_v14, %v248_v16  ;;  %621 = vperm.xlu1 %1120, %v599_v48   ;;  %616 = vperm.xlu0 %1119, %v598_v26   ;;  %v604_v16 = vld [vmem:[%s1738_s4 + $0x30] sm:$0xff]  ;;  %v249_v56 = vadd.f32 %v1522_v40, %v153_v61  ;;  %v605_v14 = vld [vmem:[%s1738_s4 + $0x38] sm:$0xff] }
  0xec   :  { %v447_v29 = vadd.f32 %v431_v34, %v347_v22  ;;  %v861_v48 = vld [vmem:[%s1739_s5 + $0x30] sm:$0xff]  ;;  %v863_v22 = vld [vmem:[%s1739_s5 + $0x40] sm:$0xff]  ;;  %v613_v61 = vld [vmem:[%s1738_s4 + $0x78] sm:$0xff] }
  0xed   :  { %v1544_v2 = vadd.f32 %v432_v25, %v348_v21  ;;  %v476_v28 = vpop.permute.xlu1 %475  ;;  %1032 = vmatprep.subr.bf16.mxu0 %v575_v32  ;;  %1063 = vmatprep.subr.bf16.mxu1 %v575_v32  ;;  %v860_v25 = vld [vmem:[%s1739_s5 + $0x28] sm:$0xff]  ;;  %v349_v21 = vadd.f32 %v333_v50, %v249_v56 }
  0xee   :  { %v530_v53 = vmul.f32 %v1490_v55, %v476_v28  ;;  %1033 = vmatpush3.bf16.msra.mxu0 %v575_v32  ;;  %1071 = vmatpush3.bf16.msra.mxu1 %v575_v32 }
  0xef   :  { %626 = vperm.xlu1 %1120, %v600_v30   ;;  %631 = vperm.xlu0 %1119, %v601_v24   ;;  %v548_v62 = vadd.f32 %v532_v38, %v1544_v2  ;;  %v608_v2 = vld [vmem:[%s1738_s4 + $0x50] sm:$0xff]  ;;  %v336_v30 = vmul.f32 %v1482_v58, %v1409_v47  ;;  %v609_v24 = vld [vmem:[%s1738_s4 + $0x58] sm:$0xff]  ;;  %v610_v47 = vld [vmem:[%s1738_s4 + $0x60] sm:$0xff] }
  0xf0   :  { %v546_v4 = vadd.f32 %v530_v53, %v446_v15 }
  0xf1   :  { %v480_v31 = vpop.permute.xlu1 %479  ;;  %v564_v26 = vmax.f32 %v548_v62, 0.0 }
  0xf2   :  { %v531_v11 = vmul.f32 %v1490_v55, %v480_v31  ;;  %v562_v7 = vmax.f32 %v546_v4, 0.0 }
  0xf3   :  { %873 = vperm.xlu1 %1120, %v855_v9   ;;  %878 = vperm.xlu0 %1119, %v856_v57  }
  0xf4   :  { %v547_v41 = vadd.f32 %v531_v11, %v447_v29  ;;  %v864_v29 = vld [vmem:[%s1739_s5 + $0x48] sm:$0xff] }
  0xf6   :  { %v563_v0 = vmax.f32 %v547_v41, 0.0  ;;  %v388_v19 = vpop.permute.xlu1 %387  ;;  %v496_v41 = vpop.permute.xlu0 %495 }
  0xf7   :  { %636 = vperm.xlu1 %1120, %v602_v18   ;;  %883 = vperm.xlu0 %1119, %v857_v54   ;;  %v433_v32 = vmul.f32 %v1485_v59, %v388_v19 }
  0xf8   :  { %v576_v33 = vpack.c.bf16 %v563_v0, %v562_v7  ;;  %v611_v7 = vld [vmem:[%s1738_s4 + $0x68] sm:$0xff]  ;;  %v866_v0 = vld [vmem:[%s1739_s5 + $0x58] sm:$0xff] }
  0xf9   :  { %v449_v28 = vadd.f32 %v433_v32, %v349_v21  ;;  %v159_v32 = vmul.f32 %v1439_v63, %v1407_v46 }
  0xfa   :  { %1034 = vmatprep.subr.bf16.mxu0 %v576_v33  ;;  %1064 = vmatprep.subr.bf16.mxu1 %v576_v33 }
  0xfb   :  { %v1577_v20 = vpop.permute.xlu1 %204  ;;  %1035 = vmatpush3.bf16.msra.mxu0 %v576_v33  ;;  %1072 = vmatpush3.bf16.msra.mxu1 %v576_v33  ;;  %v535_v33 = vmul.f32 %v1490_v55, %v496_v41 }
  0xfc   :  { %641 = vperm.xlu1 %1120, %v603_v51   ;;  %888 = vperm.xlu0 %1119, %v858_v52   ;;  %v250_v19 = vadd.f32 %v1577_v20, %v1442_v1  ;;  %v612_v52 = vld [vmem:[%s1738_s4 + $0x70] sm:$0xff] }
 0x100   :  { %v292_v8 = vpop.permute.xlu1 %291  ;;  %646 = vperm.xlu1 %1120, %v604_v16   ;;  %893 = vperm.xlu0 %1119, %v859_v12  }
 0x101   :  { %v334_v9 = vmul.f32 %v1482_v58, %v292_v8  ;;  %v867_v8 = vld [vmem:[%s1739_s5 + $0x60] sm:$0xff] }
 0x103   :  { %v350_v54 = vadd.f32 %v334_v9, %v250_v19 }
 0x104   :  { %v296_v60 = vpop.permute.xlu1 %295  ;;  %651 = vperm.xlu1 %1120, %v605_v14   ;;  %898 = vperm.xlu0 %1119, %v860_v25   ;;  %v869_v14 = vld [vmem:[%s1739_s5 + $0x70] sm:$0xff]  ;;  %v870_v25 = vld [vmem:[%s1739_s5 + $0x78] sm:$0xff] }
 0x105   :  { %v335_v10 = vmul.f32 %v1482_v58, %v296_v60 }
 0x107   :  { %v351_v40 = vadd.f32 %v335_v10, %v1478_v44  ;;  %v607_v44 = vld [vmem:[%s1738_s4 + $0x48] sm:$0xff] }
 0x108   :  { %656 = vperm.xlu1 %1120, %v606_v23   ;;  %903 = vperm.xlu0 %1119, %v861_v48   ;;  %v157_v23 = vmul.f32 %v1439_v63, %v1400_v43 }
 0x109   :  { %v451_v42 = vadd.f32 %v435_v45, %v351_v40  ;;  %v488_v3 = vpop.permute.xlu1 %487  ;;  %v339_v40 = vmul.f32 %v1482_v58, %v1415_v49 }
 0x10a   :  { %v533_v37 = vmul.f32 %v1490_v55, %v488_v3 }
 0x10b   :  { %v551_v16 = vadd.f32 %v535_v33, %v451_v42 }
 0x10c   :  { %v549_v35 = vadd.f32 %v533_v37, %v449_v28  ;;  %661 = vperm.xlu1 %1120, %v607_v44   ;;  %908 = vperm.xlu0 %1119, %v862_v36  }
 0x10d   :  { %v567_v50 = vmax.f32 %v551_v16, 0.0 }
 0x10e   :  { %v565_v13 = vmax.f32 %v549_v35, 0.0  ;;  %v392_v34 = vpop.permute.xlu1 %391 }
 0x10f   :  { %v434_v18 = vmul.f32 %v1485_v59, %v392_v34 }
 0x110   :  { %v577_v53 = vpack.c.bf16 %v565_v13, %v564_v26  ;;  %666 = vperm.xlu1 %1120, %v608_v2   ;;  %913 = vperm.xlu0 %1119, %v863_v22  }
 0x111   :  { %v450_v12 = vadd.f32 %v434_v18, %v350_v54 }
 0x112   :  { %1036 = vmatprep.subr.bf16.mxu0 %v577_v53  ;;  %1065 = vmatprep.subr.bf16.mxu1 %v577_v53 }
 0x113   :  { %v215_v15 = vpop.permute.xlu1 %214  ;;  %1037 = vmatpush3.bf16.msra.mxu0 %v577_v53  ;;  %1073 = vmatpush3.bf16.msra.mxu1 %v577_v53 }
 0x114   :  { %v252_v31 = vadd.f32 %v215_v15, %v1447_v6  ;;  %671 = vperm.xlu1 %1120, %v609_v24   ;;  %918 = vperm.xlu0 %1119, %v864_v29   ;;  %v865_v6 = vld [vmem:[%s1739_s5 + $0x50] sm:$0xff]  ;;  %v508_v15 = vpop.permute.xlu0 %507 }
 0x116   :  { %v352_v4 = vadd.f32 %v336_v30, %v252_v31 }
 0x117   :  { %v220_v11 = vpop.permute.xlu1 %219 }
 0x118   :  { %676 = vperm.xlu1 %1120, %v610_v47   ;;  %923 = vperm.xlu0 %1119, %v865_v6   ;;  %v253_v37 = vadd.f32 %v220_v11, %v157_v23  ;;  %v408_v24 = vpop.permute.xlu0 %407  ;;  %v538_v6 = vmul.f32 %v1490_v55, %v508_v15 }
 0x119   :  { %v438_v11 = vmul.f32 %v1485_v59, %v408_v24 }
 0x11c   :  { %v304_v57 = vpop.permute.xlu1 %303  ;;  %681 = vperm.xlu1 %1120, %v611_v7   ;;  %928 = vperm.xlu0 %1119, %v866_v0   ;;  %v420_v16 = vpop.permute.xlu0 %419 }
 0x11d   :  { %v337_v48 = vmul.f32 %v1482_v58, %v304_v57 }
 0x11f   :  { %v353_v44 = vadd.f32 %v337_v48, %v253_v37 }
 0x120   :  { %686 = vperm.xlu1 %1120, %v612_v52   ;;  %933 = vperm.xlu0 %1119, %v867_v8  }
 0x121   :  { %v492_v51 = vpop.permute.xlu1 %491 }
 0x122   :  { %v534_v1 = vmul.f32 %v1490_v55, %v492_v51 }
 0x124   :  { %v550_v20 = vadd.f32 %v534_v1, %v450_v12  ;;  %691 = vperm.xlu1 %1120, %v613_v61   ;;  %938 = vperm.xlu0 %1119, %v868_v39  }
 0x126   :  { %v566_v56 = vmax.f32 %v550_v20, 0.0  ;;  %v400_v60 = vpop.permute.xlu1 %399 }
 0x127   :  { %v436_v62 = vmul.f32 %v1485_v59, %v400_v60 }
 0x128   :  { %v578_v10 = vpack.c.bf16 %v567_v50, %v566_v56  ;;  %943 = vperm.xlu1 %1120, %v869_v14   ;;  %948 = vperm.xlu0 %1119, %v870_v25   ;;  %v441_v50 = vmul.f32 %v1485_v59, %v420_v16 }
 0x129   :  { %v452_v36 = vadd.f32 %v436_v62, %v352_v4 }
 0x12a   :  { %v404_v38 = vpop.permute.xlu1 %403  ;;  %1038 = vmatprep.subr.bf16.mxu0 %v578_v10  ;;  %1066 = vmatprep.subr.bf16.mxu1 %v578_v10 }
 0x12b   :  { %1039 = vmatpush3.bf16.msra.mxu0 %v578_v10  ;;  %1074 = vmatpush3.bf16.msra.mxu1 %v578_v10  ;;  %v437_v35 = vmul.f32 %v1485_v59, %v404_v38 }
 0x12d   :  { %v453_v49 = vadd.f32 %v437_v35, %v353_v44 }
 0x12f   :  { %v230_v45 = vpop.permute.xlu1 %229 }
 0x130   :  { %v255_v21 = vadd.f32 %v230_v45, %v159_v32 }
 0x132   :  { %v355_v42 = vadd.f32 %v339_v40, %v255_v21  ;;  %v1126_v40 = vld [vmem:[%s1737_s3 + $0x30] sm:$0xff]   ;;  %v1127_v21 = vld [vmem:[%s1737_s3 + $0x18] sm:$0xff]  }
 0x134   :  { %v308_v3 = vpop.permute.xlu1 %307 }
 0x135   :  { %v338_v31 = vmul.f32 %v1482_v58, %v308_v3 }
 0x137   :  { %v354_v4 = vadd.f32 %v338_v31, %v1492_v5 }
 0x139   :  { %v500_v28 = vpop.permute.xlu1 %499  ;;  %v454_v41 = vadd.f32 %v438_v11, %v354_v4 }
 0x13a   :  { %v536_v46 = vmul.f32 %v1490_v55, %v500_v28 }
 0x13b   :  { %v554_v7 = vadd.f32 %v538_v6, %v454_v41 }
 0x13c   :  { %v552_v13 = vadd.f32 %v536_v46, %v452_v36 }
 0x13d   :  { %v504_v26 = vpop.permute.xlu1 %503  ;;  %v570_v18 = vmax.f32 %v554_v7, 0.0 }
 0x13e   :  { %v537_v34 = vmul.f32 %v1490_v55, %v504_v26  ;;  %v568_v2 = vmax.f32 %v552_v13, 0.0 }
 0x140   :  { %v553_v53 = vadd.f32 %v537_v34, %v453_v49 }
 0x142   :  { %v569_v43 = vmax.f32 %v553_v53, 0.0  ;;  %v412_v63 = vpop.permute.xlu1 %411 }
 0x143   :  { %v439_v9 = vmul.f32 %v1485_v59, %v412_v63 }
 0x144   :  { %v579_v22 = vpack.c.bf16 %v569_v43, %v568_v2 }
 0x145   :  { %v455_v0 = vadd.f32 %v439_v9, %v355_v42  ;;  %v1128_v42 = vld [vmem:[%s1737_s3 + $0x38] sm:$0xff]  }
 0x146   :  { %1040 = vmatprep.subr.bf16.mxu0 %v579_v22  ;;  %1067 = vmatprep.subr.bf16.mxu1 %v579_v22 }
 0x147   :  { %v235_v30 = vpop.permute.xlu1 %234  ;;  %1041 = vmatpush3.bf16.msra.mxu0 %v579_v22  ;;  %1075 = vmatpush3.bf16.msra.mxu1 %v579_v22 }
 0x148   :  { %v256_v12 = vadd.f32 %v235_v30, %v1456_v17 }
 0x14c   :  { %v316_v29 = vpop.permute.xlu1 %315 }
 0x14d   :  { %v340_v52 = vmul.f32 %v1482_v58, %v316_v29 }
 0x14f   :  { %v356_v61 = vadd.f32 %v340_v52, %v256_v12 }
 0x150   :  { %v320_v47 = vpop.permute.xlu1 %319 }
 0x151   :  { %v341_v5 = vmul.f32 %v1482_v58, %v320_v47 }
 0x153   :  { %v357_v39 = vadd.f32 %v341_v5, %v1506_v27  ;;  %v1123_v27 = vld [vmem:[%s1737_s3 + $0x8] sm:$0xff]  }
 0x155   :  { %v512_v57 = vpop.permute.xlu1 %511  ;;  %v457_v10 = vadd.f32 %v441_v50, %v357_v39 }
 0x156   :  { %v539_v19 = vmul.f32 %v1490_v55, %v512_v57 }
 0x158   :  { %v555_v33 = vadd.f32 %v539_v19, %v455_v0 }
 0x15a   :  { %v571_v54 = vmax.f32 %v555_v33, 0.0  ;;  %v416_v51 = vpop.permute.xlu1 %415 }
 0x15b   :  { %v440_v1 = vmul.f32 %v1485_v59, %v416_v51  ;;  %v1124_v59 = vld [vmem:[%s1737_s3 + $0x28] sm:$0xff]  }
 0x15c   :  { %v580_v8 = vpack.c.bf16 %v571_v54, %v570_v18 }
 0x15d   :  { %v456_v60 = vadd.f32 %v440_v1, %v356_v61 }
 0x15e   :  { %1042 = vmatprep.subr.bf16.mxu0 %v580_v8  ;;  %1068 = vmatprep.subr.bf16.mxu1 %v580_v8 }
 0x15f   :  { %v516_v20 = vpop.permute.xlu1 %515  ;;  %1043 = vmatpush3.bf16.msra.mxu0 %v580_v8  ;;  %1076 = vmatpush3.bf16.msra.mxu1 %v580_v8 }
 0x160   :  { %v540_v56 = vmul.f32 %v1490_v55, %v516_v20 }
 0x162   :  { %v556_v14 = vadd.f32 %v540_v56, %v456_v60 }
 0x163   :  { %v520_v58 = vpop.permute.xlu1 %519 }
 0x164   :  { %v541_v17 = vmul.f32 %v1490_v55, %v520_v58  ;;  %v572_v38 = vmax.f32 %v556_v14, 0.0  ;;  %v1125_v55 = vld [vmem:[%s1737_s3 + $0x10] sm:$0xff]  }
 0x166   :  { %v557_v25 = vadd.f32 %v541_v17, %v457_v10 }
 0x168   :  { %v573_v32 = vmax.f32 %v557_v25, 0.0 }
 0x16a   :  { %v581_v45 = vpack.c.bf16 %v573_v32, %v572_v38  ;;  %v622_v3 = vpop.permute.xlu1 %621  ;;  %v617_v23 = vpop.permute.xlu0 %616 }
 0x16c   :  { %1044 = vmatprep.subr.bf16.mxu0 %v581_v45  ;;  %1069 = vmatprep.subr.bf16.mxu1 %v581_v45 }
 0x16d   :  { %1045 = vmatpush3.bf16.msra.mxu0 %v581_v45  ;;  %1077 = vmatpush3.bf16.msra.mxu1 %v581_v45 }
 0x16e   :  { %v627_v48 = vpop.permute.xlu1 %626  ;;  %v632_v62 = vpop.permute.xlu0 %631 }
 0x170   :  { %1047 = vmatmul.mubr.bf16.vlgmr.msra.gmra.mrb[0].mxu0 %v1123_v27  ;;  %1055 = vmatmul.mubr.bf16.vlgmr.msra.gmra.mrb[0].mxu1 %v1124_v59 }
 0x171   :  { %1050 = vmatprep.mubr.bf16.mxu0 %v1125_v55  ;;  %1058 = vmatprep.mubr.bf16.mxu1 %v1126_v40 }
 0x172   :  { %v874_v28 = vpop.permute.xlu1 %873  ;;  %v879_v37 = vpop.permute.xlu0 %878 }
 0x176   :  { %v637_v35 = vpop.permute.xlu1 %636  ;;  %v884_v46 = vpop.permute.xlu0 %883 }
 0x178   :  { %1051 = vmatmul.mubr.bf16.gmra.mrb[4].mxu0 %v1127_v21  ;;  %1059 = vmatmul.mubr.bf16.gmra.mrb[4].mxu1 %v1128_v42 }
 0x17b   :  { %v642_v44 = vpop.permute.xlu1 %641  ;;  %v889_v36 = vpop.permute.xlu0 %888 }
 0x17f   :  { %v647_v26 = vpop.permute.xlu1 %646  ;;  %v894_v49 = vpop.permute.xlu0 %893 }
 0x183   :  { %v652_v13 = vpop.permute.xlu1 %651  ;;  %v899_v34 = vpop.permute.xlu0 %898 }
 0x187   :  { %v657_v53 = vpop.permute.xlu1 %656  ;;  %v904_v2 = vpop.permute.xlu0 %903 }
 0x18b   :  { %v662_v43 = vpop.permute.xlu1 %661  ;;  %v909_v63 = vpop.permute.xlu0 %908 }
 0x18f   :  { %v667_v22 = vpop.permute.xlu1 %666  ;;  %v914_v15 = vpop.permute.xlu0 %913 }
 0x193   :  { %v672_v30 = vpop.permute.xlu1 %671  ;;  %v1716_v31 = vpop.permute.xlu0 %918 }
 0x197   :  { %v677_v51 = vpop.permute.xlu1 %676  ;;  %v924_v52 = vpop.permute.xlu0 %923 }
 0x243   :  { %v1048_v24 = vpop.f32.mrb[0].mxu0  ;;  %v1056_v29 = vpop.f32.mrb[0].mxu1 }
 0x244   :  { %v776_v4 = vpop.f32.mrb[1].mxu0  ;;  %v808_v11 = vpop.f32.mrb[1].mxu1  ;;  %v785_v47 = vadd.f32 %v1048_v24, %v627_v48 }
 0x245   :  { %v777_v6 = vadd.f32 %v776_v4, %v617_v23  ;;  %v1049_v41 = vpop.f32.mrb[2].mxu0  ;;  %v1057_v9 = vpop.f32.mrb[2].mxu1  ;;  %v809_v59 = vadd.f32 %v808_v11, %v657_v53 }
 0x246   :  { %v788_v57 = vadd.f32 %v1049_v41, %v632_v62  ;;  %v779_v7 = vpop.f32.mrb[3].mxu0  ;;  %v811_v0 = vpop.f32.mrb[3].mxu1  ;;  %v841_v18 = vmax.f32 %v785_v47, 0.0  ;;  %v820_v24 = vadd.f32 %v1057_v9, %v672_v30 }
 0x247   :  { %v839_v19 = vmax.f32 %v777_v6, 0.0  ;;  %v780_v33 = vadd.f32 %v779_v7, %v622_v3  ;;  %v682_v3 = vpop.permute.xlu1 %681  ;;  %v812_v23 = vadd.f32 %v811_v0, %v662_v43 }
 0x248   :  { %v842_v5 = vmax.f32 %v788_v57, 0.0  ;;  %v953_v39 = vmul.f32 %v884_v46, %v841_v18  ;;  %v847_v46 = vmax.f32 %v809_v59, 0.0  ;;  %v850_v57 = vmax.f32 %v820_v24, 0.0 }
 0x249   :  { %v840_v54 = vmax.f32 %v780_v33, 0.0  ;;  %v951_v8 = vmul.f32 %v874_v28, %v839_v19  ;;  %v848_v4 = vmax.f32 %v812_v23, 0.0 }
 0x24a   :  { %v954_v14 = vmul.f32 %v889_v36, %v842_v5  ;;  %v959_v11 = vmul.f32 %v914_v15, %v847_v46 }
 0x24b   :  { %v952_v16 = vmul.f32 %v879_v37, %v840_v54  ;;  %v1052_v12 = vpop.f32.mrb[4].mxu0  ;;  %v1060_v1 = vpop.f32.mrb[4].mxu1  ;;  %v960_v43 = vmul.f32 %v1716_v31, %v848_v4 }
 0x24c   :  { %v792_v20 = vpop.f32.mrb[5].mxu0  ;;  %v824_v61 = vpop.f32.mrb[5].mxu1  ;;  %v801_v56 = vadd.f32 %v1052_v12, %v647_v26 }
 0x24d   :  { %v967_v50 = vadd.f32 %v952_v16, %v951_v8  ;;  %v793_v60 = vadd.f32 %v792_v20, %v637_v35  ;;  %v1053_v58 = vpop.f32.mrb[6].mxu0  ;;  %v1061_v10 = vpop.f32.mrb[6].mxu1  ;;  %v817_v35 = vadd.f32 %v1056_v29, %v667_v22 }
 0x24e   :  { %v795_v17 = vpop.f32.mrb[7].mxu0  ;;  %v827_v25 = vpop.f32.mrb[7].mxu1  ;;  %v804_v45 = vadd.f32 %v1053_v58, %v652_v13  ;;  %v845_v55 = vmax.f32 %v801_v56, 0.0 }
 0x24f   :  { %v968_v38 = vadd.f32 %v967_v50, %v953_v39  ;;  %v843_v32 = vmax.f32 %v793_v60, 0.0  ;;  %v796_v27 = vadd.f32 %v795_v17, %v642_v44  ;;  %v929_v37 = vpop.permute.xlu0 %928  ;;  %v687_v44 = vpop.permute.xlu1 %686  ;;  %v849_v53 = vmax.f32 %v817_v35, 0.0 }
 0x250   :  { %v846_v62 = vmax.f32 %v804_v45, 0.0  ;;  %v957_v36 = vmul.f32 %v904_v2, %v845_v55  ;;  %v833_v22 = vadd.f32 %v1060_v1, %v687_v44  ;;  %v962_v30 = vmul.f32 %v929_v37, %v850_v57 }
 0x251   :  { %v955_v40 = vmul.f32 %v894_v49, %v843_v32  ;;  %v969_v21 = vadd.f32 %v968_v38, %v954_v14  ;;  %v844_v42 = vmax.f32 %v796_v27, 0.0  ;;  %v825_v49 = vadd.f32 %v824_v61, %v677_v51 }
 0x252   :  { %v958_v47 = vmul.f32 %v909_v63, %v846_v62  ;;  %v961_v0 = vmul.f32 %v924_v52, %v849_v53  ;;  %v853_v54 = vmax.f32 %v833_v22, 0.0  ;;  %v989_v14 = vstv %s1740_s6 }
 0x253   :  { %v970_v48 = vadd.f32 %v969_v21, %v955_v40  ;;  %v956_v28 = vmul.f32 %v899_v34, %v844_v42  ;;  %v934_v41 = vpop.permute.xlu0 %933  ;;  %v828_v34 = vadd.f32 %v827_v25, %v682_v3  ;;  %v851_v29 = vmax.f32 %v825_v49, 0.0  ;;  %v692_v19 = vpop.permute.xlu1 %691 }
 0x254   :  { %v836_v9 = vadd.f32 %v1061_v10, %v692_v19 }
 0x255   :  { %v971_v26 = vadd.f32 %v970_v48, %v956_v28  ;;  %v852_v63 = vmax.f32 %v828_v34, 0.0  ;;  %v963_v15 = vmul.f32 %v934_v41, %v851_v29 }
 0x256   :  { %v854_v5 = vmax.f32 %v836_v9, 0.0 }
 0x257   :  { %v972_v13 = vadd.f32 %v971_v26, %v957_v36  ;;  %v939_v18 = vpop.permute.xlu0 %938  ;;  %v944_v12 = vpop.permute.xlu1 %943 }
 0x258   :  { %v964_v8 = vmul.f32 %v939_v18, %v852_v63  ;;  %v965_v31 = vmul.f32 %v944_v12, %v853_v54 }
 0x259   :  { %v973_v6 = vadd.f32 %v972_v13, %v958_v47 }
 0x25b   :  { %v974_v7 = vadd.f32 %v973_v6, %v959_v11  ;;  %v949_v61 = vpop.permute.xlu0 %948 }
 0x25c   :  { %v966_v52 = vmul.f32 %v949_v61, %v854_v5 }
 0x25d   :  { %v975_v2 = vadd.f32 %v974_v7, %v960_v43 }
 0x25f   :  { %v976_v33 = vadd.f32 %v975_v2, %v961_v0 }
 0x261   :  { %v977_v51 = vadd.f32 %v976_v33, %v962_v30 }
 0x263   :  { %v978_v16 = vadd.f32 %v977_v51, %v963_v15 }
 0x265   :  { %v979_v20 = vadd.f32 %v978_v16, %v964_v8 }
 0x267   :  { %v980_v1 = vadd.f32 %v979_v20, %v965_v31 }
 0x269   :  { %v981_v39 = vadd.f32 %v980_v1, %v966_v52 }
 0x26b   :  { %v982_v50 = vrot.slane %v981_v39, 4 }
 0x26d   :  { %v983_v56 = vadd.f32 %v982_v50, %v981_v39 }
 0x26f   :  { %v984_v60 = vrot.slane %v983_v56, 2 }
 0x271   :  { %v985_v58 = vadd.f32 %v984_v60, %v983_v56 }
 0x273   :  { %v986_v10 = vrot.slane %v985_v58, 1 }
 0x275   :  { %v987_v17 = vadd.f32 %v986_v10, %v985_v58 }
 0x277   :  { %v990_v25 = vadd.f32 %v989_v14, %v987_v17 }
 0x279   :  { %991 = vst [vmem:[#allocation3] sm:$0x1] %v990_v25 }
 0x27a   :  { %1140 = shalt.err (!%p1137_p4)
}
 0x27b   :  { %s1141_s24 = scalar_lea.hbm %s1741_s7, 16 }
 0x27c   :  { %p1142_p5 = scmp.ne.s32.totalorder %s1741_s7, %s1141_s24  ;;  %p1145_p6 = scmp.lt.u32.totalorder %s1141_s24, %s1741_s7 }
 0x27e   :  { %p1147_p7 = pnand %p1145_p6, %p1142_p5 }
 0x280   :  { %1150 = shalt.err (!%p1147_p7)
}
 0x281   :  { %1001 = dma.vmem_to_hbm [thread:$0]  %s999_s19, 16, %s1741_s7, [#allocation4]  }
 0x282   :  { %1151 = dma.done.wait [#allocation4], 16  }
 0x283   :  { %1152 = vsyncadd [#allocation4], 4294967280 }
 0x284   :  { %1005 = vsyncpa [#allocation4], 1 }

</bundles_post_ra>
